<compile_context>
chip_gen: v7x
topology: tpu7x:2x2x1
jax: 0.10.0
libtpu: 0.0.40
codegen_flags: <defaults>
</compile_context>

<pallas_src>
import math

import jax
import jax.numpy as jnp
from jax.experimental import pallas as pl
from jax.experimental.pallas import tpu as pltpu


def _round_up(v, m):
    return ((v + m - 1) // m) * m


# ----------------------------- kernel ----------------------------------------

def _gcn_kernel(x_ref, adj_ref, w_ref, b_ref, out_ref, acc_ref):
    """One (row-tile i, reduction-tile k) step of out = adj @ (x @ W) + b."""
    k = pl.program_id(1)

    @pl.when(k == 0)
    def _init():
        acc_ref[...] = jnp.zeros_like(acc_ref)

    # Fused first stage: support_k = x_k @ W (recomputed per k-tile; avoids
    # materializing the full [N, out_c] support matrix in HBM).
    support = jnp.dot(x_ref[...], w_ref[...],
                      preferred_element_type=jnp.float32)
    # Feed the MXU at the native input dtype (bf16-friendly); accumulate f32.
    acc_ref[...] += jnp.dot(adj_ref[...], support.astype(adj_ref.dtype),
                            preferred_element_type=jnp.float32)

    @pl.when(k == pl.num_programs(1) - 1)
    def _finalize():
        out_ref[...] = (acc_ref[...] + b_ref[...]).astype(out_ref.dtype)


# ----------------------------- wrapper ----------------------------------------

def graph_convolution(x, adj, weight, bias=None, *, tm=256, tk=512):
    """Pallas implementation of GraphConvolution.forward (out = adj @ x @ W + b)."""
    n, in_c = x.shape
    assert adj.shape == (n, n)
    assert weight.shape[0] == in_c
    out_c = weight.shape[1]
    out_dtype = x.dtype

    # ---- lane/sublane-aligned padded shapes ---------------------------------
    in_c_p = _round_up(in_c, 128)    # lane-dense x columns / weight rows
    out_c_p = _round_up(out_c, 128)  # lane-dense output (unmasked vst)

    n_p = _round_up(n, 128)
    tk = min(tk, n_p)                # reduction tile, multiple of 128
    n_p = _round_up(n_p, tk)
    tm = min(tm, tk)                 # row tile; keep tm | n_p
    if tk % tm != 0:
        tm = tk

    # ---- zero-padded operands (padding contributes exactly zero) ------------
    x_p = jnp.zeros((n_p, in_c_p), x.dtype).at[:n, :in_c].set(x)
    adj_p = jnp.zeros((n_p, n_p), adj.dtype).at[:n, :n].set(adj)
    w_p = jnp.zeros((in_c_p, out_c_p), weight.dtype).at[:in_c, :out_c].set(weight)
    if bias is None:
        b_p = jnp.zeros((1, out_c_p), jnp.float32)
    else:
        b_p = jnp.zeros((1, out_c_p), jnp.float32).at[0, :out_c].set(
            bias.astype(jnp.float32))

    grid = (n_p // tm, n_p // tk)    # (rows: parallel, reduction: arbitrary)

    # ---- VMEM budget: double-buffered tiles + f32 accumulator ----------------
    in_bytes = x_p.dtype.itemsize
    need = (2 * (tm * tk + tk * in_c_p + tm * out_c_p) * in_bytes
            + 2 * in_c_p * out_c_p * w_p.dtype.itemsize
            + 2 * out_c_p * 4
            + tm * out_c_p * 4)
    vmem_limit = int(min(64 * 2**20, max(32 * 2**20, 2 * need)))

    cost = pl.CostEstimate(
        flops=2 * n * in_c * out_c + 2 * n * n * out_c,
        bytes_accessed=int(in_bytes * (n * n + n * in_c + n * out_c)
                           + weight.dtype.itemsize * in_c * out_c),
        transcendentals=0,
    )

    out_p = pl.pallas_call(
        _gcn_kernel,
        out_shape=jax.ShapeDtypeStruct((n_p, out_c_p), out_dtype),
        grid_spec=pltpu.PrefetchScalarGridSpec(
            num_scalar_prefetch=0,
            grid=grid,
            in_specs=[
                pl.BlockSpec((tk, in_c_p), lambda i, k: (k, 0)),       # x tile
                pl.BlockSpec((tm, tk), lambda i, k: (i, k)),           # adj tile
                pl.BlockSpec((in_c_p, out_c_p), lambda i, k: (0, 0)),  # W (resident)
                pl.BlockSpec((1, out_c_p), lambda i, k: (0, 0)),       # bias (resident)
            ],
            out_specs=pl.BlockSpec((tm, out_c_p), lambda i, k: (i, 0)),
            scratch_shapes=[pltpu.VMEM((tm, out_c_p), jnp.float32)],
        ),
        compiler_params=pltpu.CompilerParams(
            dimension_semantics=("parallel", "arbitrary"),
            vmem_limit_bytes=vmem_limit),
        cost_estimate=cost,
    )(x_p, adj_p, w_p, b_p)

    return out_p[:n, :out_c]


# ------------------------- parameter init ------------------------------------

def init_params(key, in_channels, out_channels, use_bias=False,
                dtype=jnp.float32):
    """Deterministic init mirroring kaiming_uniform_(a=sqrt(5)) on [in_c, out_c]."""
    kw, kb = jax.random.split(key)
    # PyTorch _calculate_fan_in_and_fan_out on a 2-D [in_c, out_c] tensor:
    # fan_in = size(1) = out_channels.
    fan_in = out_channels
    gain = math.sqrt(2.0 / (1.0 + 5.0))            # a = sqrt(5)
    bound_w = gain * math.sqrt(3.0 / fan_in)
    weight = jax.random.uniform(kw, (in_channels, out_channels),
                                minval=-bound_w, maxval=bound_w, dtype=dtype)
    bias = None
    if use_bias:
        bound_b = 1.0 / math.sqrt(fan_in)
        bias = jax.random.uniform(kb, (out_channels,),
                                  minval=-bound_b, maxval=bound_b, dtype=dtype)
    return weight, bias


# ------------------------------ demo -----------------------------------------

if __name__ == "__main__":
    key = jax.random.PRNGKey(0)
    k_x, k_adj, k_p, k_x2, k_adj2 = jax.random.split(key, 5)
    hi = jax.lax.Precision.HIGHEST

    # Small demo shapes (single tile after padding).
    num_nodes, in_channels, out_channels = 16, 8, 32
    x = jax.random.normal(k_x, (num_nodes, in_channels), dtype=jnp.float32)
    a = jax.random.uniform(k_adj, (num_nodes, num_nodes), dtype=jnp.float32)
    adj = (a + a.T) * 0.5
    weight, bias = init_params(k_p, in_channels, out_channels, use_bias=True)

    # No-bias path.
    out0 = jax.block_until_ready(graph_convolution(x, adj, weight, None))
    ref0 = jnp.dot(adj, jnp.dot(x, weight, precision=hi), precision=hi)
    assert out0.shape == (num_nodes, out_channels)
    assert jnp.allclose(out0, ref0, atol=1e-4, rtol=1e-4)

    # Bias path.
    out1 = jax.block_until_ready(graph_convolution(x, adj, weight, bias))
    assert jnp.allclose(out1, ref0 + bias, atol=1e-4, rtol=1e-4)

    # Multi-tile path (exercises grid, f32 accumulator, padding, finalize).
    n2, ic2, oc2 = 300, 24, 40
    x2 = jax.random.normal(k_x2, (n2, ic2), dtype=jnp.float32)
    a2 = jax.random.uniform(k_adj2, (n2, n2), dtype=jnp.float32)
    adj2 = (a2 + a2.T) * 0.5
    w2, b2 = init_params(k_p, ic2, oc2, use_bias=True)
    out2 = jax.block_until_ready(
        graph_convolution(x2, adj2, w2, b2, tm=128, tk=128))
    ref2 = jnp.dot(adj2, jnp.dot(x2, w2, precision=hi), precision=hi) + b2
    assert out2.shape == (n2, oc2)
    assert jnp.allclose(out2, ref2, atol=5e-3, rtol=5e-3)

    print("KERNEL_OK")
</pallas_src>

<mosaic_0001>
module attributes {stable_mosaic.version = 11 : i64} {
  func.func @_gcn_kernel(%arg0: i32, %arg1: i32, %arg2: memref<128x128xf32, #tpu.memory_space<vmem>>, %arg3: memref<128x128xf32, #tpu.memory_space<vmem>>, %arg4: memref<128x128xf32, #tpu.memory_space<vmem>>, %arg5: memref<1x128xf32, #tpu.memory_space<vmem>>, %arg6: memref<128x128xf32, #tpu.memory_space<vmem>>, %arg7: memref<128x128xf32, #tpu.memory_space<vmem>>) attributes {dimension_semantics = [#tpu.dimension_semantics<parallel>, #tpu.dimension_semantics<arbitrary>], iteration_bounds = array<i64: 1, 1>, scalar_prefetch = 0 : i64, scratch_operands = 1 : i64, tpu.core_type = #tpu.core_type<tc>, window_params = [{transform_indices = @transform_0, window_bounds = array<i64: 128, 128>}, {transform_indices = @transform_1, window_bounds = array<i64: 128, 128>}, {pipeline_mode = #tpu.pipeline_mode<synchronous>, transform_indices = @transform_2, window_bounds = array<i64: 128, 128>}, {pipeline_mode = #tpu.pipeline_mode<synchronous>, transform_indices = @transform_3, window_bounds = array<i64: 1, 128>}, {transform_indices = @transform_4, window_bounds = array<i64: 128, 128>}]} {
    %c0_i32 = arith.constant 0 : i32
    %0 = arith.cmpi eq, %arg1, %c0_i32 : i32
    %1 = arith.extui %0 : i1 to i32
    %c0_i32_0 = arith.constant 0 : i32
    %2 = arith.cmpi ne, %1, %c0_i32_0 : i32
    scf.if %2 {
      %cst_13 = arith.constant 0.000000e+00 : f32
      %14 = vector.broadcast %cst_13 : f32 to vector<128x128xf32>
      %c0_14 = arith.constant 0 : index
      %c0_15 = arith.constant 0 : index
      %15 = vector.load %arg7[%c0_14, %c0_15] : memref<128x128xf32, #tpu.memory_space<vmem>>, vector<128x128xf32>
      tpu.vector_store %arg7[%c0_14, %c0_15], %14 {strides = array<i32>} : memref<128x128xf32, #tpu.memory_space<vmem>>, vector<128x128xf32>,
    } else {
    }
    %c0 = arith.constant 0 : index
    %c0_1 = arith.constant 0 : index
    %3 = vector.load %arg2[%c0, %c0_1] : memref<128x128xf32, #tpu.memory_space<vmem>>, vector<128x128xf32>
    %c0_2 = arith.constant 0 : index
    %c0_3 = arith.constant 0 : index
    %4 = vector.load %arg4[%c0_2, %c0_3] : memref<128x128xf32, #tpu.memory_space<vmem>>, vector<128x128xf32>
    %cst = arith.constant dense<0.000000e+00> : vector<128x128xf32>
    %5 = tpu.matmul %3, %4, %cst {dimension_numbers = #tpu.dot_dimension_numbers<[1], [0], [0], [1], [0, 0, 1, 1], [], []>} : vector<128x128xf32>, vector<128x128xf32>, vector<128x128xf32> -> vector<128x128xf32>
    %c0_4 = arith.constant 0 : index
    %c0_5 = arith.constant 0 : index
    %6 = vector.load %arg7[%c0_4, %c0_5] : memref<128x128xf32, #tpu.memory_space<vmem>>, vector<128x128xf32>
    %c0_6 = arith.constant 0 : index
    %c0_7 = arith.constant 0 : index
    %7 = vector.load %arg3[%c0_6, %c0_7] : memref<128x128xf32, #tpu.memory_space<vmem>>, vector<128x128xf32>
    %cst_8 = arith.constant dense<0.000000e+00> : vector<128x128xf32>
    %8 = tpu.matmul %7, %5, %cst_8 {dimension_numbers = #tpu.dot_dimension_numbers<[1], [0], [0], [1], [0, 0, 1, 1], [], []>} : vector<128x128xf32>, vector<128x128xf32>, vector<128x128xf32> -> vector<128x128xf32>
    %9 = arith.addf %6, %8 : vector<128x128xf32>
    %c0_9 = arith.constant 0 : index
    %c0_10 = arith.constant 0 : index
    %10 = vector.load %arg7[%c0_9, %c0_10] : memref<128x128xf32, #tpu.memory_space<vmem>>, vector<128x128xf32>
    tpu.vector_store %arg7[%c0_9, %c0_10], %9 {strides = array<i32>} : memref<128x128xf32, #tpu.memory_space<vmem>>, vector<128x128xf32>,
    %c0_i32_11 = arith.constant 0 : i32
    %11 = arith.cmpi eq, %arg1, %c0_i32_11 : i32
    %12 = arith.extui %11 : i1 to i32
    %c0_i32_12 = arith.constant 0 : i32
    %13 = arith.cmpi ne, %12, %c0_i32_12 : i32
    scf.if %13 {
      %c0_13 = arith.constant 0 : index
      %c0_14 = arith.constant 0 : index
      %14 = vector.load %arg7[%c0_13, %c0_14] : memref<128x128xf32, #tpu.memory_space<vmem>>, vector<128x128xf32>
      %c0_15 = arith.constant 0 : index
      %c0_16 = arith.constant 0 : index
      %15 = vector.load %arg5[%c0_15, %c0_16] : memref<1x128xf32, #tpu.memory_space<vmem>>, vector<1x128xf32>
      %16 = vector.broadcast %15 : vector<1x128xf32> to vector<128x128xf32>
      %17 = arith.addf %14, %16 : vector<128x128xf32>
      %c0_17 = arith.constant 0 : index
      %c0_18 = arith.constant 0 : index
      %18 = vector.load %arg6[%c0_17, %c0_18] : memref<128x128xf32, #tpu.memory_space<vmem>>, vector<128x128xf32>
      tpu.vector_store %arg6[%c0_17, %c0_18], %17 {strides = array<i32>} : memref<128x128xf32, #tpu.memory_space<vmem>>, vector<128x128xf32>,
    } else {
    }
    return
  }
  func.func @transform_0(%arg0: i32, %arg1: i32) -> (i32, i32) {
    %c0_i32 = arith.constant 0 : i32
    %c0_i32_0 = arith.constant 0 : i32
    return %arg1, %c0_i32 : i32, i32
  }
  func.func @transform_1(%arg0: i32, %arg1: i32) -> (i32, i32) {
    %c0_i32 = arith.constant 0 : i32
    return %arg0, %arg1 : i32, i32
  }
  func.func @transform_2(%arg0: i32, %arg1: i32) -> (i32, i32) {
    %c0_i32 = arith.constant 0 : i32
    %c0_i32_0 = arith.constant 0 : i32
    %c0_i32_1 = arith.constant 0 : i32
    return %c0_i32, %c0_i32_0 : i32, i32
  }
  func.func @transform_3(%arg0: i32, %arg1: i32) -> (i32, i32) {
    %c0_i32 = arith.constant 0 : i32
    %c0_i32_0 = arith.constant 0 : i32
    %c0_i32_1 = arith.constant 0 : i32
    return %c0_i32, %c0_i32_0 : i32, i32
  }
  func.func @transform_4(%arg0: i32, %arg1: i32) -> (i32, i32) {
    %c0_i32 = arith.constant 0 : i32
    %c0_i32_0 = arith.constant 0 : i32
    return %arg0, %c0_i32 : i32, i32
  }
}

</mosaic_0001>

<bundles_post_ra>
// kernel: tpu_custom_call.1
= control target key start
LH: loop header
LB: loop body
LE: loop exit
PB: predicated region body
PF: predicated region fallthrough
CT: control target
= control target key end

     0   :  { %9 = vsyncpa [#allocation4], 0  ;;  %s983_s0 = inlined_call_operand.hbm [shape: f32[128,128], index: 0, kind: input, shape index: {}]   ;;  %s984_s1 = inlined_call_operand.hbm [shape: f32[128,128], index: 1, kind: input, shape index: {}]   ;;  %s985_s2 = inlined_call_operand.hbm [shape: f32[128,128], index: 2, kind: input, shape index: {}]   ;;  %s986_s3 = inlined_call_operand.vmem [shape: f32[1,128], index: 3, kind: input, shape index: {}]   ;;  %s987_s4 = inlined_call_operand.hbm [shape: f32[128,128], index: 4, kind: output, shape index: {}]  }
   0x1   :  { %10 = vsyncpa [#allocation7], 0 }
   0x2   :  { %11 = vsyncpa [#allocation5], 0  ;;  %s882_s15 = smov [#allocation6]   ;;  %s883_s17 = smov [#allocation3]  }
   0x3   :  { %s29_s16 = sshll.u32 %s882_s15, 4  ;;  %s17_s18 = sshll.u32 %s883_s17, 4  ;;  %s30_s16 = int_to_ptr.vmem [resolvable:$true] %s29_s16  ;;  %s913_s18 = int_to_ptr.vmem [resolvable:$true] %s17_s18 }
   0x4   :  { %s788_s21 = scalar_lea.hbm %s984_s1, 2048 }
   0x5   :  { %p789_p0 = scmp.ne.s32.totalorder %s984_s1, %s788_s21  ;;  %p792_p1 = scmp.lt.u32.totalorder %s788_s21, %s984_s1 }
   0x7   :  { %p794_p2 = pnand %p792_p1, %p789_p0 }
   0x9   :  { %797 = shalt.err (!%p794_p2)
}
   0xa   :  { %s798_s26 = scalar_lea.vmem %s30_s16, 2048  ;;  %p803_p4 = scmp.lt.s32.totalorder %s30_s16, %s30_s16 }
   0xb   :  { %p799_p3 = scmp.ne.s32.totalorder %s30_s16, %s798_s26  ;;  %p804_p5 = scmp.lt.s32.totalorder %s798_s26, %s798_s26 }
   0xd   :  { %p805_p6 = por %p804_p5, %p803_p4 }
   0xf   :  { %p806_p7 = pnand %p805_p6, %p799_p3 }
  0x11   :  { %809 = shalt.err (!%p806_p7)
}
  0x12   :  { %s884_s27 = smov 128   ;;  %s885_s28 = smov 8  }
  0x13   :  { %35 = dma.hbm_to_vmem [thread:$0]  %s984_s1, 2048, %s30_s16, [#allocation7], %s884_s27, %s884_s27, %s885_s28  }
  0x14   :  { %s810_s7 = scalar_lea.hbm %s983_s0, 2048 }
  0x15   :  { %p811_p8 = scmp.ne.s32.totalorder %s983_s0, %s810_s7  ;;  %p814_p9 = scmp.lt.u32.totalorder %s810_s7, %s983_s0 }
  0x17   :  { %p816_p10 = pnand %p814_p9, %p811_p8 }
  0x19   :  { %819 = shalt.err (!%p816_p10)
}
  0x1a   :  { %s820_s12 = scalar_lea.vmem %s913_s18, 2048  ;;  %p825_p12 = scmp.lt.s32.totalorder %s913_s18, %s913_s18 }
  0x1b   :  { %p821_p11 = scmp.ne.s32.totalorder %s913_s18, %s820_s12  ;;  %p826_p13 = scmp.lt.s32.totalorder %s820_s12, %s820_s12 }
  0x1d   :  { %p827_p0 = por %p826_p13, %p825_p12 }
  0x1f   :  { %p828_p1 = pnand %p827_p0, %p821_p11 }
  0x21   :  { %831 = shalt.err (!%p828_p1)
}
  0x22   :  { %23 = dma.hbm_to_vmem [thread:$0]  %s983_s0, 2048, %s913_s18, [#allocation4], %s884_s27, %s884_s27, %s885_s28  }
  0x23   :  { %s886_s14 = smov [#allocation8]   ;;  %s832_s19 = scalar_lea.hbm %s985_s2, 2048 }
  0x24   :  { %s41_s15 = sshll.u32 %s886_s14, 4  ;;  %p833_p2 = scmp.ne.s32.totalorder %s985_s2, %s832_s19  ;;  %s42_s15 = int_to_ptr.vmem [resolvable:$true] %s41_s15 }
  0x25   :  { %p836_p3 = scmp.lt.u32.totalorder %s832_s19, %s985_s2 }
  0x27   :  { %p838_p4 = pnand %p836_p3, %p833_p2 }
  0x29   :  { %841 = shalt.err (!%p838_p4)
}
  0x2a   :  { %s842_s24 = scalar_lea.vmem %s42_s15, 2048  ;;  %p847_p6 = scmp.lt.s32.totalorder %s42_s15, %s42_s15 }
  0x2b   :  { %p843_p5 = scmp.ne.s32.totalorder %s42_s15, %s842_s24  ;;  %p848_p7 = scmp.lt.s32.totalorder %s842_s24, %s842_s24 }
  0x2d   :  { %p849_p8 = por %p848_p7, %p847_p6 }
  0x2f   :  { %p850_p9 = pnand %p849_p8, %p843_p5 }
  0x31   :  { %853 = shalt.err (!%p850_p9)
}
  0x32   :  { %47 = dma.hbm_to_vmem [thread:$0]  %s985_s2, 2048, %s42_s15, [#allocation7], %s884_s27, %s884_s27, %s885_s28  }
  0x33   :  { %876 = dma.done.wait [#allocation4], 2048  }
  0x34   :  { %877 = vsyncadd [#allocation4], 4294965248 }
  0x35   :  { %878 = dma.done.wait [#allocation7], 4096  }
  0x36   :  { %879 = vsyncadd [#allocation7], 4294963200  ;;  %v95_v0 = vld [vmem:[#allocation8] sm:$0xff]  ;;  %v96_v1 = vld [vmem:[#allocation8 + $0x8] sm:$0xff] }
  0x37   :  { %v97_v2 = vld [vmem:[#allocation8 + $0x10] sm:$0xff]  ;;  %v718_v3 = vpack.c.bf16 %v96_v1, %v95_v0  ;;  %v98_v4 = vld [vmem:[#allocation8 + $0x18] sm:$0xff]  ;;  %v99_v6 = vld [vmem:[#allocation8 + $0x20] sm:$0xff] }
  0x38   :  { %v722_v5 = vpack.c.bf16 %v98_v4, %v97_v2  ;;  %v100_v7 = vld [vmem:[#allocation8 + $0x28] sm:$0xff]  ;;  %v79_v9 = vld [vmem:[#allocation3] sm:$0xff]  ;;  %v101_v10 = vld [vmem:[#allocation8 + $0x30] sm:$0xff] }
  0x39   :  { %719 = vmatprep.subr.bf16.mxu0 %v718_v3  ;;  %v726_v8 = vpack.c.bf16 %v100_v7, %v99_v6  ;;  %v102_v11 = vld [vmem:[#allocation8 + $0x38] sm:$0xff]  ;;  %638 = vmatprep.mubr.f32.mxu0 %v79_v9  ;;  %v103_v13 = vld [vmem:[#allocation8 + $0x40] sm:$0xff]  ;;  %v104_v14 = vld [vmem:[#allocation8 + $0x48] sm:$0xff] }
  0x3a   :  { %721 = vmatpush3.bf16.msra.mxu0 %v718_v3  ;;  %v730_v12 = vpack.c.bf16 %v102_v11, %v101_v10  ;;  %v734_v15 = vpack.c.bf16 %v104_v14, %v103_v13  ;;  %v105_v16 = vld [vmem:[#allocation8 + $0x50] sm:$0xff]  ;;  %v106_v17 = vld [vmem:[#allocation8 + $0x58] sm:$0xff]  ;;  %v107_v19 = vld [vmem:[#allocation8 + $0x60] sm:$0xff] }
  0x3b   :  { %723 = vmatprep.subr.bf16.mxu0 %v722_v5  ;;  %v738_v18 = vpack.c.bf16 %v106_v17, %v105_v16  ;;  %v108_v20 = vld [vmem:[#allocation8 + $0x68] sm:$0xff]  ;;  %v109_v22 = vld [vmem:[#allocation8 + $0x70] sm:$0xff]  ;;  %v110_v23 = vld [vmem:[#allocation8 + $0x78] sm:$0xff] }
  0x3c   :  { %v742_v21 = vpack.c.bf16 %v108_v20, %v107_v19  ;;  %v746_v24 = vpack.c.bf16 %v110_v23, %v109_v22  ;;  %v80_v25 = vld [vmem:[#allocation3 + $0x8] sm:$0xff]  ;;  %v81_v26 = vld [vmem:[#allocation3 + $0x10] sm:$0xff]  ;;  %v82_v27 = vld [vmem:[#allocation3 + $0x18] sm:$0xff] }
  0x3d   :  { %v83_v28 = vld [vmem:[#allocation3 + $0x20] sm:$0xff]  ;;  %v84_v29 = vld [vmem:[#allocation3 + $0x28] sm:$0xff]  ;;  %v85_v30 = vld [vmem:[#allocation3 + $0x30] sm:$0xff] }
  0x3e   :  { %725 = vmatpush3.bf16.msra.mxu0 %v722_v5  ;;  %v86_v31 = vld [vmem:[#allocation3 + $0x38] sm:$0xff]  ;;  %v87_v32 = vld [vmem:[#allocation3 + $0x40] sm:$0xff]  ;;  %v88_v33 = vld [vmem:[#allocation3 + $0x48] sm:$0xff] }
  0x3f   :  { %727 = vmatprep.subr.bf16.mxu0 %v726_v8  ;;  %v89_v34 = vld [vmem:[#allocation3 + $0x50] sm:$0xff]  ;;  %v90_v35 = vld [vmem:[#allocation3 + $0x58] sm:$0xff]  ;;  %v91_v36 = vld [vmem:[#allocation3 + $0x60] sm:$0xff] }
  0x40   :  { %v92_v37 = vld [vmem:[#allocation3 + $0x68] sm:$0xff]  ;;  %v93_v38 = vld [vmem:[#allocation3 + $0x70] sm:$0xff]  ;;  %v94_v39 = vld [vmem:[#allocation3 + $0x78] sm:$0xff] }
  0x41   :  { %v272_v40 = vld [vmem:[#allocation6] sm:$0xff]  ;;  %v273_v1 = vld [vmem:[#allocation6 + $0x8] sm:$0xff]  ;;  %v274_v2 = vld [vmem:[#allocation6 + $0x10] sm:$0xff] }
  0x42   :  { %729 = vmatpush3.bf16.msra.mxu0 %v726_v8  ;;  %694 = vmatprep.mubr.f32.mxu1 %v272_v40  ;;  %v275_v3 = vld [vmem:[#allocation6 + $0x18] sm:$0xff]  ;;  %v276_v4 = vld [vmem:[#allocation6 + $0x20] sm:$0xff]  ;;  %v277_v5 = vld [vmem:[#allocation6 + $0x28] sm:$0xff] }
  0x43   :  { %731 = vmatprep.subr.bf16.mxu0 %v730_v12  ;;  %v278_v6 = vld [vmem:[#allocation6 + $0x30] sm:$0xff]  ;;  %v279_v7 = vld [vmem:[#allocation6 + $0x38] sm:$0xff]  ;;  %v280_v8 = vld [vmem:[#allocation6 + $0x40] sm:$0xff] }
  0x44   :  { %v281_v9 = vld [vmem:[#allocation6 + $0x48] sm:$0xff]  ;;  %v282_v10 = vld [vmem:[#allocation6 + $0x50] sm:$0xff]  ;;  %v283_v11 = vld [vmem:[#allocation6 + $0x58] sm:$0xff] }
  0x45   :  { %v285_v13 = vld [vmem:[#allocation6 + $0x68] sm:$0xff]  ;;  %v286_v14 = vld [vmem:[#allocation6 + $0x70] sm:$0xff]  ;;  %v541_v16 = vld [vmem:[%s986_s3] ss:$0 sm:$0xff]  ;;  %s887_s3 = smov [#allocation9]  }
  0x46   :  { %733 = vmatpush3.bf16.msra.mxu0 %v730_v12  ;;  %v284_v12 = vld [vmem:[#allocation6 + $0x60] sm:$0xff]  ;;  %s528_s26 = sshll.u32 %s887_s3, 4  ;;  %s529_s26 = int_to_ptr.vmem [resolvable:$true] %s528_s26 }
  0x47   :  { %735 = vmatprep.subr.bf16.mxu0 %v734_v15  ;;  %s854_s29 = scalar_lea.vmem %s529_s26, 2048  ;;  %p859_p11 = scmp.lt.s32.totalorder %s529_s26, %s529_s26 }
  0x48   :  { %p855_p10 = scmp.ne.s32.totalorder %s529_s26, %s854_s29  ;;  %p860_p12 = scmp.lt.s32.totalorder %s854_s29, %s854_s29 }
  0x4a   :  { %737 = vmatpush3.bf16.msra.mxu0 %v734_v15  ;;  %v287_v15 = vld [vmem:[#allocation6 + $0x78] sm:$0xff]  ;;  %p861_p13 = por %p860_p12, %p859_p11 }
  0x4b   :  { %739 = vmatprep.subr.bf16.mxu0 %v738_v18 }
  0x4c   :  { %p862_p0 = pnand %p861_p13, %p855_p10 }
  0x4e   :  { %741 = vmatpush3.bf16.msra.mxu0 %v738_v18 }
  0x4f   :  { %743 = vmatprep.subr.bf16.mxu0 %v742_v21 }
  0x52   :  { %745 = vmatpush3.bf16.msra.mxu0 %v742_v21 }
  0x53   :  { %747 = vmatprep.subr.bf16.mxu0 %v746_v24 }
  0x56   :  { %749 = vmatpush3.bf16.msra.mxu0 %v746_v24 }
  0x59   :  { %639 = vmatmul.mubr.f32.vlgmr.msra.gmra.mrb[0].mxu0 %v80_v25 }
  0x5a   :  { %641 = vmatprep.mubr.f32.mxu0 %v81_v26 }
  0x5d   :  { %642 = vmatmul.mubr.f32.gmra.mrb[2].mxu0 %v82_v27 }
  0x5e   :  { %644 = vmatprep.mubr.f32.mxu0 %v83_v28 }
  0x61   :  { %645 = vmatmul.mubr.f32.gmra.mrb[4].mxu0 %v84_v29 }
  0x62   :  { %647 = vmatprep.mubr.f32.mxu0 %v85_v30 }
  0x65   :  { %648 = vmatmul.mubr.f32.gmra.mrb[6].mxu0 %v86_v31 }
  0x66   :  { %650 = vmatprep.mubr.f32.mxu0 %v87_v32 }
  0x69   :  { %651 = vmatmul.mubr.f32.gmra.mrb[8].mxu0 %v88_v33 }
  0x6a   :  { %653 = vmatprep.mubr.f32.mxu0 %v89_v34 }
  0x6d   :  { %654 = vmatmul.mubr.f32.gmra.mrb[10].mxu0 %v90_v35 }
  0x6e   :  { %656 = vmatprep.mubr.f32.mxu0 %v91_v36 }
  0x71   :  { %657 = vmatmul.mubr.f32.gmra.mrb[12].mxu0 %v92_v37 }
  0x72   :  { %659 = vmatprep.mubr.f32.mxu0 %v93_v38 }
  0x75   :  { %660 = vmatmul.mubr.f32.gmra.mrb[14].mxu0 %v94_v39 }
 0x12c   :  { %v640_v41 = vpop.f32.mrb[0].mxu0 }
 0x12d   :  { %v177_v42 = vpop.f32.mrb[1].mxu0 }
 0x12e   :  { %v750_v43 = vpack.c.bf16 %v640_v41, %v177_v42 }
 0x130   :  { %v643_v44 = vpop.f32.mrb[2].mxu0  ;;  %751 = vmatprep.subr.bf16.mxu1 %v750_v43 }
 0x131   :  { %v187_v45 = vpop.f32.mrb[3].mxu0  ;;  %753 = vmatpush3.bf16.msra.mxu1 %v750_v43 }
 0x132   :  { %v754_v46 = vpack.c.bf16 %v643_v44, %v187_v45 }
 0x134   :  { %v646_v47 = vpop.f32.mrb[4].mxu0  ;;  %755 = vmatprep.subr.bf16.mxu1 %v754_v46 }
 0x135   :  { %v197_v48 = vpop.f32.mrb[5].mxu0  ;;  %757 = vmatpush3.bf16.msra.mxu1 %v754_v46 }
 0x136   :  { %v758_v49 = vpack.c.bf16 %v646_v47, %v197_v48 }
 0x138   :  { %v649_v50 = vpop.f32.mrb[6].mxu0  ;;  %759 = vmatprep.subr.bf16.mxu1 %v758_v49 }
 0x139   :  { %v207_v51 = vpop.f32.mrb[7].mxu0  ;;  %761 = vmatpush3.bf16.msra.mxu1 %v758_v49 }
 0x13a   :  { %v762_v52 = vpack.c.bf16 %v649_v50, %v207_v51 }
 0x13c   :  { %v652_v53 = vpop.f32.mrb[8].mxu0  ;;  %763 = vmatprep.subr.bf16.mxu1 %v762_v52 }
 0x13d   :  { %v217_v54 = vpop.f32.mrb[9].mxu0  ;;  %765 = vmatpush3.bf16.msra.mxu1 %v762_v52 }
 0x13e   :  { %v766_v55 = vpack.c.bf16 %v652_v53, %v217_v54 }
 0x140   :  { %v655_v56 = vpop.f32.mrb[10].mxu0  ;;  %767 = vmatprep.subr.bf16.mxu1 %v766_v55 }
 0x141   :  { %v227_v57 = vpop.f32.mrb[11].mxu0  ;;  %769 = vmatpush3.bf16.msra.mxu1 %v766_v55 }
 0x142   :  { %v770_v58 = vpack.c.bf16 %v655_v56, %v227_v57 }
 0x144   :  { %v658_v59 = vpop.f32.mrb[12].mxu0  ;;  %771 = vmatprep.subr.bf16.mxu1 %v770_v58 }
 0x145   :  { %v237_v60 = vpop.f32.mrb[13].mxu0  ;;  %773 = vmatpush3.bf16.msra.mxu1 %v770_v58 }
 0x146   :  { %v774_v61 = vpack.c.bf16 %v658_v59, %v237_v60 }
 0x148   :  { %v661_v62 = vpop.f32.mrb[14].mxu0  ;;  %775 = vmatprep.subr.bf16.mxu1 %v774_v61 }
 0x149   :  { %v247_v63 = vpop.f32.mrb[15].mxu0  ;;  %777 = vmatpush3.bf16.msra.mxu1 %v774_v61 }
 0x14a   :  { %v778_v0 = vpack.c.bf16 %v661_v62, %v247_v63 }
 0x14c   :  { %779 = vmatprep.subr.bf16.mxu1 %v778_v0 }
 0x14d   :  { %781 = vmatpush3.bf16.msra.mxu1 %v778_v0 }
 0x150   :  { %695 = vmatmul.mubr.f32.vlgmr.msra.gmra.mrb[0].mxu1 %v273_v1 }
 0x151   :  { %697 = vmatprep.mubr.f32.mxu1 %v274_v2 }
 0x154   :  { %698 = vmatmul.mubr.f32.gmra.mrb[2].mxu1 %v275_v3 }
 0x155   :  { %700 = vmatprep.mubr.f32.mxu1 %v276_v4 }
 0x158   :  { %701 = vmatmul.mubr.f32.gmra.mrb[4].mxu1 %v277_v5 }
 0x159   :  { %703 = vmatprep.mubr.f32.mxu1 %v278_v6 }
 0x15c   :  { %704 = vmatmul.mubr.f32.gmra.mrb[6].mxu1 %v279_v7 }
 0x15d   :  { %706 = vmatprep.mubr.f32.mxu1 %v280_v8 }
 0x160   :  { %707 = vmatmul.mubr.f32.gmra.mrb[8].mxu1 %v281_v9 }
 0x161   :  { %709 = vmatprep.mubr.f32.mxu1 %v282_v10 }
 0x164   :  { %710 = vmatmul.mubr.f32.gmra.mrb[10].mxu1 %v283_v11 }
 0x165   :  { %712 = vmatprep.mubr.f32.mxu1 %v284_v12 }
 0x168   :  { %713 = vmatmul.mubr.f32.gmra.mrb[12].mxu1 %v285_v13 }
 0x169   :  { %715 = vmatprep.mubr.f32.mxu1 %v286_v14 }
 0x16c   :  { %716 = vmatmul.mubr.f32.gmra.mrb[14].mxu1 %v287_v15 }
 0x223   :  { %v696_v17 = vpop.f32.mrb[0].mxu1 }
 0x224   :  { %v492_v18 = vadd.f32 %v696_v17, %v541_v16  ;;  %v354_v19 = vpop.f32.mrb[1].mxu1 }
 0x225   :  { %v491_v20 = vadd.f32 %v541_v16, %v354_v19 }
 0x226   :  { %508 = vst [vmem:[#allocation9 + $0x8] sm:$0xff] %v492_v18 }
 0x227   :  { %507 = vst [vmem:[#allocation9] sm:$0xff] %v491_v20  ;;  %v699_v21 = vpop.f32.mrb[2].mxu1 }
 0x228   :  { %v494_v22 = vadd.f32 %v699_v21, %v541_v16  ;;  %v364_v23 = vpop.f32.mrb[3].mxu1 }
 0x229   :  { %v493_v24 = vadd.f32 %v541_v16, %v364_v23 }
 0x22a   :  { %510 = vst [vmem:[#allocation9 + $0x18] sm:$0xff] %v494_v22 }
 0x22b   :  { %509 = vst [vmem:[#allocation9 + $0x10] sm:$0xff] %v493_v24  ;;  %v702_v25 = vpop.f32.mrb[4].mxu1 }
 0x22c   :  { %v496_v26 = vadd.f32 %v702_v25, %v541_v16  ;;  %v374_v27 = vpop.f32.mrb[5].mxu1 }
 0x22d   :  { %v495_v28 = vadd.f32 %v541_v16, %v374_v27 }
 0x22e   :  { %512 = vst [vmem:[#allocation9 + $0x28] sm:$0xff] %v496_v26 }
 0x22f   :  { %511 = vst [vmem:[#allocation9 + $0x20] sm:$0xff] %v495_v28  ;;  %v705_v29 = vpop.f32.mrb[6].mxu1 }
 0x230   :  { %v498_v30 = vadd.f32 %v705_v29, %v541_v16  ;;  %v384_v31 = vpop.f32.mrb[7].mxu1 }
 0x231   :  { %v497_v32 = vadd.f32 %v541_v16, %v384_v31 }
 0x232   :  { %514 = vst [vmem:[#allocation9 + $0x38] sm:$0xff] %v498_v30 }
 0x233   :  { %513 = vst [vmem:[#allocation9 + $0x30] sm:$0xff] %v497_v32  ;;  %v708_v33 = vpop.f32.mrb[8].mxu1 }
 0x234   :  { %v500_v34 = vadd.f32 %v708_v33, %v541_v16  ;;  %v394_v35 = vpop.f32.mrb[9].mxu1 }
 0x235   :  { %v499_v36 = vadd.f32 %v541_v16, %v394_v35 }
 0x236   :  { %516 = vst [vmem:[#allocation9 + $0x48] sm:$0xff] %v500_v34 }
 0x237   :  { %515 = vst [vmem:[#allocation9 + $0x40] sm:$0xff] %v499_v36  ;;  %v711_v37 = vpop.f32.mrb[10].mxu1 }
 0x238   :  { %v502_v38 = vadd.f32 %v711_v37, %v541_v16  ;;  %v404_v39 = vpop.f32.mrb[11].mxu1 }
 0x239   :  { %v501_v40 = vadd.f32 %v541_v16, %v404_v39 }
 0x23a   :  { %518 = vst [vmem:[#allocation9 + $0x58] sm:$0xff] %v502_v38 }
 0x23b   :  { %517 = vst [vmem:[#allocation9 + $0x50] sm:$0xff] %v501_v40  ;;  %v714_v41 = vpop.f32.mrb[12].mxu1 }
 0x23c   :  { %v504_v42 = vadd.f32 %v714_v41, %v541_v16  ;;  %v414_v43 = vpop.f32.mrb[13].mxu1 }
 0x23d   :  { %v503_v44 = vadd.f32 %v541_v16, %v414_v43 }
 0x23e   :  { %520 = vst [vmem:[#allocation9 + $0x68] sm:$0xff] %v504_v42 }
 0x23f   :  { %519 = vst [vmem:[#allocation9 + $0x60] sm:$0xff] %v503_v44  ;;  %v717_v45 = vpop.f32.mrb[14].mxu1 }
 0x240   :  { %v506_v46 = vadd.f32 %v717_v45, %v541_v16  ;;  %v424_v47 = vpop.f32.mrb[15].mxu1 }
 0x241   :  { %v505_v48 = vadd.f32 %v541_v16, %v424_v47 }
 0x242   :  { %522 = vst [vmem:[#allocation9 + $0x78] sm:$0xff] %v506_v46 }
 0x243   :  { %521 = vst [vmem:[#allocation9 + $0x70] sm:$0xff] %v505_v48 }
 0x244   :  { %865 = shalt.err (!%p862_p0)
}
 0x245   :  { %s866_s6 = scalar_lea.hbm %s987_s4, 2048 }
 0x246   :  { %p867_p1 = scmp.ne.s32.totalorder %s987_s4, %s866_s6  ;;  %p870_p2 = scmp.lt.u32.totalorder %s866_s6, %s987_s4 }
 0x248   :  { %p872_p3 = pnand %p870_p2, %p867_p1 }
 0x24a   :  { %875 = shalt.err (!%p872_p3)
}
 0x24b   :  { %534 = dma.vmem_to_hbm [thread:$0]  %s529_s26, 2048, %s987_s4, [#allocation5], %s884_s27, %s884_s27, %s885_s28  }
 0x24c   :  { %880 = dma.done.wait [#allocation5], 2048  }
 0x24d   :  { %881 = vsyncadd [#allocation5], 4294965248 }
 0x24e   :  { %538 = vsyncpa [#allocation4], 1 }
 0x24f   :  { %539 = vsyncpa [#allocation7], 1 }
 0x250   :  { %540 = vsyncpa [#allocation5], 1 }

</bundles_post_ra>
